<compile_context>
chip_gen: v7x
topology: tpu7x:2x2x1
jax: 0.10.0
libtpu: 0.0.40
codegen_flags: <defaults>
</compile_context>

<pallas_src>
import functools

import jax
import jax.numpy as jnp
from jax.experimental import pallas as pl
from jax.experimental.pallas import tpu as pltpu


# --------------------------------------------------------------------------
# Generation-aware budgets
# --------------------------------------------------------------------------
def _detect_vmem_capacity():
    try:
        cap = int(pltpu.get_tpu_info().vmem_capacity_bytes)
        if cap >= 16 * 1024 * 1024:
            return cap
    except Exception:
        pass
    return 64 * 1024 * 1024  # conservative default (v7x per-core VMEM)


_VMEM_CAPACITY = _detect_vmem_capacity()
_VMEM_LIMIT = min((_VMEM_CAPACITY * 3) // 4, 100 * 1024 * 1024)  # 96MiB / 48MiB


def _compute_fused_max_nodes():
    """Largest padded node count whose fused-path working set (A bf16 plus
    ~32 B/row of f32 temporaries at C=128) fits in ~60% of the VMEM limit."""
    budget = (_VMEM_LIMIT * 3) // 5
    n = 128
    while 2 * (n + 128) ** 2 + 32 * (n + 128) * 128 <= budget:
        n += 128
    return n


_FUSED_MAX_NODES = _compute_fused_max_nodes()


# --------------------------------------------------------------------------
# Pallas kernels
# --------------------------------------------------------------------------
def _fused_net_kernel(a_ref, x_ref, dis_ref, w1_ref, w2_ref, p1_ref, p2_ref,
                      o_ref):
    """Whole network in one grid step (small graphs).  a_ref = (A+I) bf16,
    dis_ref = D^{-1/2} per row, p1 = [scale; shift+b1*scale], p2 = [b2]."""
    dis = dis_ref[...]                                              # (N, 1) f32
    xw1 = jnp.dot(x_ref[...], w1_ref[...],
                  preferred_element_type=jnp.float32) * dis
    h = jnp.dot(a_ref[...], xw1.astype(jnp.bfloat16),
                preferred_element_type=jnp.float32)
    h = jnp.maximum(h * dis * p1_ref[0:1, :] + p1_ref[1:2, :], 0.0)
    hw2 = jnp.dot(h.astype(jnp.bfloat16), w2_ref[...],
                  preferred_element_type=jnp.float32) * dis
    out = jnp.dot(a_ref[...], hw2.astype(jnp.bfloat16),
                  preferred_element_type=jnp.float32)
    o_ref[...] = out * dis + p2_ref[0:1, :]


def _xw_scale_kernel(x_ref, w_ref, dis_ref, o_ref):
    """Row tile of D^{-1/2} @ (X @ W)  (feature transform, computed once)."""
    xw = jnp.dot(x_ref[...], w_ref[...], preferred_element_type=jnp.float32)
    o_ref[...] = (xw * dis_ref[...]).astype(o_ref.dtype)


def _prop1_kernel(a_ref, xw_ref, w2_ref, p1_ref, dis_ref, o_ref, acc_ref):
    """K-tiled (A+I) @ XW with fused BN+ReLU and h @ W2 epilogue.
    Grid = (row tiles, k tiles); output = D^{-1/2} relu(bn(A_hat X W1)) W2."""
    @pl.when(pl.program_id(1) == 0)
    def _():
        acc_ref[...] = jnp.zeros_like(acc_ref)

    acc_ref[...] += jnp.dot(a_ref[...], xw_ref[...],
                            preferred_element_type=jnp.float32)

    @pl.when(pl.program_id(1) == pl.num_programs(1) - 1)
    def _():
        dis = dis_ref[...]                                          # (tm, 1)
        h = jnp.maximum(acc_ref[...] * dis * p1_ref[0:1, :] + p1_ref[1:2, :],
                        0.0)
        hw2 = jnp.dot(h.astype(jnp.bfloat16), w2_ref[...],
                      preferred_element_type=jnp.float32)
        o_ref[...] = (hw2 * dis).astype(o_ref.dtype)


def _prop2_kernel(a_ref, hw_ref, p2_ref, dis_ref, o_ref, acc_ref):
    """K-tiled (A+I) @ HW2 with D^{-1/2} + bias epilogue (final layer)."""
    @pl.when(pl.program_id(1) == 0)
    def _():
        acc_ref[...] = jnp.zeros_like(acc_ref)

    acc_ref[...] += jnp.dot(a_ref[...], hw_ref[...],
                            preferred_element_type=jnp.float32)

    @pl.when(pl.program_id(1) == pl.num_programs(1) - 1)
    def _():
        o_ref[...] = acc_ref[...] * dis_ref[...] + p2_ref[0:1, :]


# --------------------------------------------------------------------------
# pallas_call wrappers
# --------------------------------------------------------------------------
def _full_spec(arr):
    """BlockSpec covering the whole array (constant block index on any grid)."""
    nd = arr.ndim
    return pl.BlockSpec(arr.shape, lambda *args, _nd=nd: (0,) * _nd)


def _fused_forward(a, x, dis, w1, w2, p1, p2):
    n_pad = a.shape[0]
    c_pad = w2.shape[1]
    args = (a, x, dis, w1, w2, p1, p2)
    return pl.pallas_call(
        _fused_net_kernel,
        out_shape=jax.ShapeDtypeStruct((n_pad, c_pad), jnp.float32),
        grid_spec=pltpu.PrefetchScalarGridSpec(
            num_scalar_prefetch=0,
            grid=(1,),
            in_specs=[_full_spec(t) for t in args],
            out_specs=pl.BlockSpec((n_pad, c_pad), lambda i: (0, 0)),
        ),
        compiler_params=pltpu.CompilerParams(
            dimension_semantics=("arbitrary",),
            vmem_limit_bytes=_VMEM_LIMIT),
    )(*args)


def _xw_rows(x, w, dis, tm, out_dtype):
    """XW = D^{-1/2} (X @ W), tiled over rows with a large (mem-bound) tile."""
    n_pad, c_in_pad = x.shape
    c_pad = w.shape[1]
    return pl.pallas_call(
        _xw_scale_kernel,
        out_shape=jax.ShapeDtypeStruct((n_pad, c_pad), out_dtype),
        grid_spec=pltpu.PrefetchScalarGridSpec(
            num_scalar_prefetch=0,
            grid=(n_pad // tm,),
            in_specs=[pl.BlockSpec((tm, c_in_pad), lambda i: (i, 0)),
                      _full_spec(w),
                      pl.BlockSpec((tm, 1), lambda i: (i, 0))],
            out_specs=pl.BlockSpec((tm, c_pad), lambda i: (i, 0)),
        ),
        compiler_params=pltpu.CompilerParams(
            dimension_semantics=("parallel",),
            vmem_limit_bytes=_VMEM_LIMIT),
    )(x, w, dis)


def _propagate1(a, xw, w2, p1, dis, tm, tk):
    """First propagation (K-tiled) with BN/ReLU/W2 epilogue -> bf16 output."""
    n_pad = a.shape[0]
    c_pad = xw.shape[1]
    return pl.pallas_call(
        _prop1_kernel,
        out_shape=jax.ShapeDtypeStruct((n_pad, c_pad), jnp.bfloat16),
        grid_spec=pltpu.PrefetchScalarGridSpec(
            num_scalar_prefetch=0,
            grid=(n_pad // tm, n_pad // tk),
            in_specs=[pl.BlockSpec((tm, tk), lambda i, k: (i, k)),
                      pl.BlockSpec((tk, c_pad), lambda i, k: (k, 0)),
                      _full_spec(w2),
                      _full_spec(p1),
                      pl.BlockSpec((tm, 1), lambda i, k: (i, 0))],
            out_specs=pl.BlockSpec((tm, c_pad), lambda i, k: (i, 0)),
            scratch_shapes=[pltpu.VMEM((tm, c_pad), jnp.float32)],
        ),
        compiler_params=pltpu.CompilerParams(
            dimension_semantics=("parallel", "arbitrary"),
            vmem_limit_bytes=_VMEM_LIMIT),
    )(a, xw, w2, p1, dis)


def _propagate2(a, hw, p2, dis, tm, tk):
    """Second propagation (K-tiled), f32 output with bias epilogue."""
    n_pad = a.shape[0]
    c_pad = hw.shape[1]
    return pl.pallas_call(
        _prop2_kernel,
        out_shape=jax.ShapeDtypeStruct((n_pad, c_pad), jnp.float32),
        grid_spec=pltpu.PrefetchScalarGridSpec(
            num_scalar_prefetch=0,
            grid=(n_pad // tm, n_pad // tk),
            in_specs=[pl.BlockSpec((tm, tk), lambda i, k: (i, k)),
                      pl.BlockSpec((tk, c_pad), lambda i, k: (k, 0)),
                      _full_spec(p2),
                      pl.BlockSpec((tm, 1), lambda i, k: (i, 0))],
            out_specs=pl.BlockSpec((tm, c_pad), lambda i, k: (i, 0)),
            scratch_shapes=[pltpu.VMEM((tm, c_pad), jnp.float32)],
        ),
        compiler_params=pltpu.CompilerParams(
            dimension_semantics=("parallel", "arbitrary"),
            vmem_limit_bytes=_VMEM_LIMIT),
    )(a, hw, p2, dis)


def _largest_divisor_tile(n, candidates):
    for c in candidates:
        if c <= n and n % c == 0:
            return c
    return 128


# --------------------------------------------------------------------------
# Glue: params, padding, forward wrapper, reference
# --------------------------------------------------------------------------
def init_params(key, in_channels, out_channels):
    k1, k2, k3, k4, k5, k6 = jax.random.split(key, 6)
    s1 = 1.0 / jnp.sqrt(jnp.float32(in_channels))
    s2 = 1.0 / jnp.sqrt(jnp.float32(out_channels))
    return {
        "w1": jax.random.uniform(k1, (in_channels, out_channels), jnp.float32, -s1, s1),
        "b1": jax.random.uniform(k2, (1, out_channels), jnp.float32, -s1, s1),
        "w2": jax.random.uniform(k3, (out_channels, out_channels), jnp.float32, -s2, s2),
        "b2": jax.random.uniform(k4, (1, out_channels), jnp.float32, -s2, s2),
        # BatchNorm(out_channels): gamma, beta; eval-mode running stats
        "gamma": 1.0 + 0.1 * jax.random.normal(k5, (1, out_channels), jnp.float32),
        "beta": 0.1 * jax.random.normal(k6, (1, out_channels), jnp.float32),
        "running_mean": jnp.zeros((1, out_channels), jnp.float32),
        "running_var": jnp.ones((1, out_channels), jnp.float32),
    }


def _pad_to(arr, rows, cols, value=0.0):
    return jnp.pad(arr, ((0, rows - arr.shape[0]), (0, cols - arr.shape[1])),
                   constant_values=value)


@functools.partial(jax.jit, static_argnames=("force_tiled",))
def net_forward(x, edge_index, params, *, force_tiled=False):
    n, c_in = x.shape
    c_out = params["w1"].shape[1]
    n_pad = pl.cdiv(n, 128) * 128
    c_in_pad = pl.cdiv(c_in, 128) * 128
    c_out_pad = pl.cdiv(c_out, 128) * 128

    # (A + I) built directly in bf16 at padded size; entries are small integers
    # (exact in bf16).  D^{-1/2} applied inside the kernels via `dis`.
    # TODO(synk): dense O(N^2) adjacency; a scalar-prefetch sparse gather design
    # is the eventual fix for genuinely large graphs.
    src = edge_index[0].astype(jnp.int32)
    dst = edge_index[1].astype(jnp.int32)
    diag = jnp.arange(n, dtype=jnp.int32)
    a = jnp.zeros((n_pad, n_pad), jnp.bfloat16)
    a = a.at[dst, src].add(1.0)          # A[i, j] += 1 per edge j -> i
    a = a.at[diag, diag].add(1.0)        # self loops

    deg = jnp.zeros((n_pad,), jnp.float32).at[dst].add(1.0)
    deg = deg.at[diag].add(1.0)          # padded rows keep deg = 0
    dis = jnp.where(deg > 0, 1.0 / jnp.sqrt(jnp.where(deg > 0, deg, 1.0)), 0.0)
    dis = dis.reshape(n_pad, 1)

    x_pad = _pad_to(x, n_pad, c_in_pad).astype(jnp.bfloat16)
    w1 = _pad_to(params["w1"], c_in_pad, c_out_pad).astype(jnp.bfloat16)
    w2 = _pad_to(params["w2"], c_out_pad, c_out_pad).astype(jnp.bfloat16)

    # Fold eval-mode BatchNorm + conv1 bias into per-feature scale/shift,
    # packed into a single lane-dense (8, C) f32 block.
    eps = 1e-5
    scale = params["gamma"] / jnp.sqrt(params["running_var"] + eps)
    shift = params["beta"] - params["running_mean"] * scale
    shift1 = shift + params["b1"] * scale
    p1 = jnp.zeros((8, c_out_pad), jnp.float32)
    p1 = p1.at[0, :c_out].set(scale[0]).at[1, :c_out].set(shift1[0])
    p2 = jnp.zeros((8, c_out_pad), jnp.float32)
    p2 = p2.at[0, :c_out].set(params["b2"][0])

    # TODO(synk): dropout skipped (inference / training=False semantics).

    if (not force_tiled) and n_pad <= _FUSED_MAX_NODES:
        # Small graph: whole network in one pallas_call, A_hat DMA'd once.
        z_pad = _fused_forward(a, x_pad, dis, w1, w2, p1, p2)
    else:
        # Large graph: hoisted X@W1 + two K-tiled propagations (h@W2 fused
        # into the first propagation epilogue).
        tm = _largest_divisor_tile(n_pad, (256, 128))
        tk = _largest_divisor_tile(n_pad, (512, 256, 128))
        tm_x = _largest_divisor_tile(n_pad, (2048, 1024, 512, 256, 128))
        xw1 = _xw_rows(x_pad, w1, dis, tm_x, jnp.bfloat16)
        hw2 = _propagate1(a, xw1, w2, p1, dis, tm, tk)
        z_pad = _propagate2(a, hw2, p2, dis, tm, tk)
    return z_pad[:n, :c_out]


def build_norm_adj(edge_index, num_nodes):
    """Dense f32 A_hat = D^{-1/2}(A+I)D^{-1/2} (reference only)."""
    src, dst = edge_index[0], edge_index[1]
    a = jnp.zeros((num_nodes, num_nodes), jnp.float32)
    a = a.at[dst, src].add(1.0)
    a = a + jnp.eye(num_nodes, dtype=jnp.float32)
    deg = jnp.sum(a, axis=1)
    d_inv_sqrt = jnp.where(deg > 0, 1.0 / jnp.sqrt(deg), 0.0)
    return d_inv_sqrt[:, None] * a * d_inv_sqrt[None, :]


def reference_forward(x, edge_index, params):
    """Pure-JAX f32 reference with identical eval-mode semantics."""
    a_hat = build_norm_adj(edge_index, x.shape[0])
    eps = 1e-5
    scale = params["gamma"] / jnp.sqrt(params["running_var"] + eps)
    shift = params["beta"] - params["running_mean"] * scale
    h = a_hat @ (x @ params["w1"]) + params["b1"]
    h = jnp.maximum(h * scale + shift, 0.0)
    return a_hat @ (h @ params["w2"]) + params["b2"]


if __name__ == "__main__":
    key = jax.random.PRNGKey(0)
    k_x, k_e, k_p, k_x2, k_e2 = jax.random.split(key, 5)

    in_channels, out_channels = 16, 32
    params = init_params(k_p, in_channels, out_channels)

    # --- small graph: fully fused single-pallas_call path --------------------
    n1, e1 = 128, 256
    x1 = jax.random.normal(k_x, (n1, in_channels), jnp.float32)
    ei1 = jax.random.randint(k_e, (2, e1), 0, n1, jnp.int32)
    z1 = net_forward(x1, ei1, params)
    jax.block_until_ready(z1)
    ref1 = reference_forward(x1, ei1, params)
    assert z1.shape == (n1, out_channels)
    assert bool(jnp.all(jnp.isfinite(z1)))
    tol1 = 0.02 + 0.05 * float(jnp.max(jnp.abs(ref1)))
    assert float(jnp.max(jnp.abs(z1 - ref1))) < tol1

    # --- non-128-multiple graph: K-tiled propagation path --------------------
    n2, e2 = 300, 600
    x2 = jax.random.normal(k_x2, (n2, in_channels), jnp.float32)
    ei2 = jax.random.randint(k_e2, (2, e2), 0, n2, jnp.int32)
    z2 = net_forward(x2, ei2, params, force_tiled=True)
    jax.block_until_ready(z2)
    ref2 = reference_forward(x2, ei2, params)
    assert z2.shape == (n2, out_channels)
    assert bool(jnp.all(jnp.isfinite(z2)))
    tol2 = 0.02 + 0.05 * float(jnp.max(jnp.abs(ref2)))
    assert float(jnp.max(jnp.abs(z2 - ref2))) < tol2

    print("KERNEL_OK")
</pallas_src>

<mosaic_0001>
module attributes {stable_mosaic.version = 11 : i64} {
  func.func private @main(%arg0: i32) attributes {dimension_semantics = [#tpu.dimension_semantics<core_parallel>], iteration_bounds = array<i64: 2>, tpu.core_type = #tpu.core_type<sc_scalar_subcore>, window_params = []} {
    return
  }
}

module attributes {stable_mosaic.version = 11 : i64} {
  func.func private @main(%arg0: i32) attributes {dimension_semantics = [#tpu.dimension_semantics<core_parallel>], iteration_bounds = array<i64: 2>, tpu.core_type = #tpu.core_type<sc_scalar_subcore>, window_params = []} {
    return
  }
}

module attributes {stable_mosaic.version = 11 : i64} {
  func.func @_fused_net_kernel(%arg0: i32, %arg1: memref<128x128xbf16, #tpu.memory_space<vmem>>, %arg2: memref<128x128xbf16, #tpu.memory_space<vmem>>, %arg3: memref<128x1xf32, #tpu.memory_space<vmem>>, %arg4: memref<128x128xbf16, #tpu.memory_space<vmem>>, %arg5: memref<128x128xbf16, #tpu.memory_space<vmem>>, %arg6: memref<8x128xf32, #tpu.memory_space<vmem>>, %arg7: memref<8x128xf32, #tpu.memory_space<vmem>>, %arg8: memref<128x128xf32, #tpu.memory_space<vmem>>) attributes {dimension_semantics = [#tpu.dimension_semantics<arbitrary>], iteration_bounds = array<i64: 1>, scalar_prefetch = 0 : i64, scratch_operands = 0 : i64, tpu.core_type = #tpu.core_type<tc>, window_params = [{pipeline_mode = #tpu.pipeline_mode<synchronous>, transform_indices = @transform_0, window_bounds = array<i64: 128, 128>}, {pipeline_mode = #tpu.pipeline_mode<synchronous>, transform_indices = @transform_1, window_bounds = array<i64: 128, 128>}, {pipeline_mode = #tpu.pipeline_mode<synchronous>, transform_indices = @transform_2, window_bounds = array<i64: 128, 1>}, {pipeline_mode = #tpu.pipeline_mode<synchronous>, transform_indices = @transform_3, window_bounds = array<i64: 128, 128>}, {pipeline_mode = #tpu.pipeline_mode<synchronous>, transform_indices = @transform_4, window_bounds = array<i64: 128, 128>}, {pipeline_mode = #tpu.pipeline_mode<synchronous>, transform_indices = @transform_5, window_bounds = array<i64: 8, 128>}, {pipeline_mode = #tpu.pipeline_mode<synchronous>, transform_indices = @transform_6, window_bounds = array<i64: 8, 128>}, {pipeline_mode = #tpu.pipeline_mode<synchronous>, transform_indices = @transform_7, window_bounds = array<i64: 128, 128>}]} {
    %c0 = arith.constant 0 : index
    %c0_0 = arith.constant 0 : index
    %0 = vector.load %arg3[%c0, %c0_0] : memref<128x1xf32, #tpu.memory_space<vmem>>, vector<128x1xf32>
    %c0_1 = arith.constant 0 : index
    %c0_2 = arith.constant 0 : index
    %1 = vector.load %arg2[%c0_1, %c0_2] : memref<128x128xbf16, #tpu.memory_space<vmem>>, vector<128x128xbf16>
    %c0_3 = arith.constant 0 : index
    %c0_4 = arith.constant 0 : index
    %2 = vector.load %arg4[%c0_3, %c0_4] : memref<128x128xbf16, #tpu.memory_space<vmem>>, vector<128x128xbf16>
    %cst = arith.constant dense<0.000000e+00> : vector<128x128xf32>
    %3 = tpu.matmul %1, %2, %cst {dimension_numbers = #tpu.dot_dimension_numbers<[1], [0], [0], [1], [0, 0, 1, 1], [], []>} : vector<128x128xbf16>, vector<128x128xbf16>, vector<128x128xf32> -> vector<128x128xf32>
    %4 = vector.broadcast %0 : vector<128x1xf32> to vector<128x128xf32>
    %5 = arith.mulf %3, %4 : vector<128x128xf32>
    %c0_5 = arith.constant 0 : index
    %c0_6 = arith.constant 0 : index
    %6 = vector.load %arg1[%c0_5, %c0_6] : memref<128x128xbf16, #tpu.memory_space<vmem>>, vector<128x128xbf16>
    %7 = arith.truncf %5 : vector<128x128xf32> to vector<128x128xbf16>
    %cst_7 = arith.constant dense<0.000000e+00> : vector<128x128xf32>
    %8 = tpu.matmul %6, %7, %cst_7 {dimension_numbers = #tpu.dot_dimension_numbers<[1], [0], [0], [1], [0, 0, 1, 1], [], []>} : vector<128x128xbf16>, vector<128x128xbf16>, vector<128x128xf32> -> vector<128x128xf32>
    %9 = vector.broadcast %0 : vector<128x1xf32> to vector<128x128xf32>
    %10 = arith.mulf %8, %9 : vector<128x128xf32>
    %c0_8 = arith.constant 0 : index
    %c0_9 = arith.constant 0 : index
    %11 = vector.load %arg6[%c0_8, %c0_9] : memref<8x128xf32, #tpu.memory_space<vmem>>, vector<1x128xf32>
    %12 = vector.broadcast %11 : vector<1x128xf32> to vector<128x128xf32>
    %13 = arith.mulf %10, %12 : vector<128x128xf32>
    %c1 = arith.constant 1 : index
    %c0_10 = arith.constant 0 : index
    %14 = vector.load %arg6[%c1, %c0_10] : memref<8x128xf32, #tpu.memory_space<vmem>>, vector<1x128xf32>
    %15 = vector.broadcast %14 : vector<1x128xf32> to vector<128x128xf32>
    %16 = arith.addf %13, %15 : vector<128x128xf32>
    %cst_11 = arith.constant 0.000000e+00 : f32
    %17 = vector.broadcast %cst_11 : f32 to vector<128x128xf32>
    %18 = arith.maximumf %16, %17 : vector<128x128xf32>
    %19 = arith.truncf %18 : vector<128x128xf32> to vector<128x128xbf16>
    %c0_12 = arith.constant 0 : index
    %c0_13 = arith.constant 0 : index
    %20 = vector.load %arg5[%c0_12, %c0_13] : memref<128x128xbf16, #tpu.memory_space<vmem>>, vector<128x128xbf16>
    %cst_14 = arith.constant dense<0.000000e+00> : vector<128x128xf32>
    %21 = tpu.matmul %19, %20, %cst_14 {dimension_numbers = #tpu.dot_dimension_numbers<[1], [0], [0], [1], [0, 0, 1, 1], [], []>} : vector<128x128xbf16>, vector<128x128xbf16>, vector<128x128xf32> -> vector<128x128xf32>
    %22 = vector.broadcast %0 : vector<128x1xf32> to vector<128x128xf32>
    %23 = arith.mulf %21, %22 : vector<128x128xf32>
    %c0_15 = arith.constant 0 : index
    %c0_16 = arith.constant 0 : index
    %24 = vector.load %arg1[%c0_15, %c0_16] : memref<128x128xbf16, #tpu.memory_space<vmem>>, vector<128x128xbf16>
    %25 = arith.truncf %23 : vector<128x128xf32> to vector<128x128xbf16>
    %cst_17 = arith.constant dense<0.000000e+00> : vector<128x128xf32>
    %26 = tpu.matmul %24, %25, %cst_17 {dimension_numbers = #tpu.dot_dimension_numbers<[1], [0], [0], [1], [0, 0, 1, 1], [], []>} : vector<128x128xbf16>, vector<128x128xbf16>, vector<128x128xf32> -> vector<128x128xf32>
    %27 = vector.broadcast %0 : vector<128x1xf32> to vector<128x128xf32>
    %28 = arith.mulf %26, %27 : vector<128x128xf32>
    %c0_18 = arith.constant 0 : index
    %c0_19 = arith.constant 0 : index
    %29 = vector.load %arg7[%c0_18, %c0_19] : memref<8x128xf32, #tpu.memory_space<vmem>>, vector<1x128xf32>
    %30 = vector.broadcast %29 : vector<1x128xf32> to vector<128x128xf32>
    %31 = arith.addf %28, %30 : vector<128x128xf32>
    %c0_20 = arith.constant 0 : index
    %c0_21 = arith.constant 0 : index
    %32 = vector.load %arg8[%c0_20, %c0_21] : memref<128x128xf32, #tpu.memory_space<vmem>>, vector<128x128xf32>
    tpu.vector_store %arg8[%c0_20, %c0_21], %31 {strides = array<i32>} : memref<128x128xf32, #tpu.memory_space<vmem>>, vector<128x128xf32>,
    return
  }
  func.func @transform_0(%arg0: i32) -> (i32, i32) {
    %c0_i32 = arith.constant 0 : i32
    %c0_i32_0 = arith.constant 0 : i32
    %c0_i32_1 = arith.constant 0 : i32
    return %c0_i32, %c0_i32_0 : i32, i32
  }
  func.func @transform_1(%arg0: i32) -> (i32, i32) {
    %c0_i32 = arith.constant 0 : i32
    %c0_i32_0 = arith.constant 0 : i32
    %c0_i32_1 = arith.constant 0 : i32
    return %c0_i32, %c0_i32_0 : i32, i32
  }
  func.func @transform_2(%arg0: i32) -> (i32, i32) {
    %c0_i32 = arith.constant 0 : i32
    %c0_i32_0 = arith.constant 0 : i32
    %c0_i32_1 = arith.constant 0 : i32
    return %c0_i32, %c0_i32_0 : i32, i32
  }
  func.func @transform_3(%arg0: i32) -> (i32, i32) {
    %c0_i32 = arith.constant 0 : i32
    %c0_i32_0 = arith.constant 0 : i32
    %c0_i32_1 = arith.constant 0 : i32
    return %c0_i32, %c0_i32_0 : i32, i32
  }
  func.func @transform_4(%arg0: i32) -> (i32, i32) {
    %c0_i32 = arith.constant 0 : i32
    %c0_i32_0 = arith.constant 0 : i32
    %c0_i32_1 = arith.constant 0 : i32
    return %c0_i32, %c0_i32_0 : i32, i32
  }
  func.func @transform_5(%arg0: i32) -> (i32, i32) {
    %c0_i32 = arith.constant 0 : i32
    %c0_i32_0 = arith.constant 0 : i32
    %c0_i32_1 = arith.constant 0 : i32
    return %c0_i32, %c0_i32_0 : i32, i32
  }
  func.func @transform_6(%arg0: i32) -> (i32, i32) {
    %c0_i32 = arith.constant 0 : i32
    %c0_i32_0 = arith.constant 0 : i32
    %c0_i32_1 = arith.constant 0 : i32
    return %c0_i32, %c0_i32_0 : i32, i32
  }
  func.func @transform_7(%arg0: i32) -> (i32, i32) {
    %c0_i32 = arith.constant 0 : i32
    %c0_i32_0 = arith.constant 0 : i32
    %c0_i32_1 = arith.constant 0 : i32
    return %c0_i32, %c0_i32_0 : i32, i32
  }
}

</mosaic_0001>

<bundles_post_ra>
// kernel: net_forward.1
= control target key start
LH: loop header
LB: loop body
LE: loop exit
PB: predicated region body
PF: predicated region fallthrough
CT: control target
= control target key end

     0   :  { %v1216_v1 = vmov 0   ;;  %s1622_s3 = inlined_call_operand.vmem [shape: bf16[128,128], index: 3, kind: input, shape index: {}]   ;;  %s1623_s1 = inlined_call_operand.vmem [shape: bf16[128,128], index: 1, kind: input, shape index: {}]   ;;  %s1624_s2 = inlined_call_operand.vmem [shape: f32[128,1], index: 2, kind: input, shape index: {}]   ;;  %s1625_s0 = inlined_call_operand.vmem [shape: bf16[128,128], index: 0, kind: input, shape index: {}]   ;;  %s1626_s4 = inlined_call_operand.vmem [shape: bf16[128,128], index: 4, kind: input, shape index: {}]   ;;  %s1627_s5 = inlined_call_operand.vmem [shape: f32[8,128], index: 5, kind: input, shape index: {}]   ;;  %s1628_s6 = inlined_call_operand.vmem [shape: f32[8,128], index: 6, kind: input, shape index: {}]   ;;  %s1629_s7 = inlined_call_operand.vmem [shape: f32[128,128], index: 7, kind: output, shape index: {}]  }
   0x1   :  { %v1184_v0 = vld [vmem:[%s1622_s3] sm:$0xff]   ;;  %1182 = vset.pattern.permute.xlu0 %v1216_v1  ;;  %1183 = vset.pattern.permute.xlu1 %v1216_v1  ;;  %v1185_v2 = vld [vmem:[%s1622_s3 + $0x8] sm:$0xff]   ;;  %v1186_v3 = vld [vmem:[%s1622_s3 + $0x10] sm:$0xff]  }
   0x2   :  { %1053 = vmatprep.subr.bf16.mxu0 %v1184_v0  ;;  %v1187_v4 = vld [vmem:[%s1622_s3 + $0x18] sm:$0xff]   ;;  %v1192_v5 = vld [vmem:[%s1623_s1] sm:$0xff]   ;;  %v1189_v7 = vld [vmem:[%s1622_s3 + $0x28] sm:$0xff]  }
   0x3   :  { %1054 = vmatpush3.bf16.msra.mxu0 %v1184_v0  ;;  %1069 = vmatprep.mubr.bf16.mxu0 %v1192_v5  ;;  %v1188_v6 = vld [vmem:[%s1622_s3 + $0x20] sm:$0xff]   ;;  %v29_v9 = vld [vmem:[%s1624_s2 + $0x10] sm:$0xff]  ;;  %v28_v10 = vld [vmem:[%s1624_s2 + $0x8] sm:$0xff] }
   0x4   :  { %1055 = vmatprep.subr.bf16.mxu0 %v1185_v2  ;;  %v27_v8 = vld [vmem:[%s1624_s2] sm:$0xff]  ;;  %280 = vperm.xlu1 %1183, %v29_v9   ;;  %v30_v11 = vld [vmem:[%s1624_s2 + $0x18] sm:$0xff]  ;;  %v1190_v12 = vld [vmem:[%s1622_s3 + $0x30] sm:$0xff]  }
   0x5   :  { %270 = vperm.xlu0 %1182, %v27_v8   ;;  %v31_v13 = vld [vmem:[%s1624_s2 + $0x20] sm:$0xff]  ;;  %v32_v14 = vld [vmem:[%s1624_s2 + $0x28] sm:$0xff]  ;;  %v1191_v15 = vld [vmem:[%s1622_s3 + $0x38] sm:$0xff]  }
   0x6   :  { %v33_v16 = vld [vmem:[%s1624_s2 + $0x30] sm:$0xff]  ;;  %v34_v17 = vld [vmem:[%s1624_s2 + $0x38] sm:$0xff]  ;;  %v1193_v18 = vld [vmem:[%s1623_s1 + $0x8] sm:$0xff]  }
   0x7   :  { %1056 = vmatpush3.bf16.msra.mxu0 %v1185_v2  ;;  %v35_v19 = vld [vmem:[%s1624_s2 + $0x40] sm:$0xff]  ;;  %v36_v20 = vld [vmem:[%s1624_s2 + $0x48] sm:$0xff]  ;;  %v1194_v21 = vld [vmem:[%s1623_s1 + $0x10] sm:$0xff]  }
   0x8   :  { %1057 = vmatprep.subr.bf16.mxu0 %v1186_v3  ;;  %285 = vperm.xlu1 %1183, %v30_v11   ;;  %v37_v22 = vld [vmem:[%s1624_s2 + $0x50] sm:$0xff]  ;;  %v38_v23 = vld [vmem:[%s1624_s2 + $0x58] sm:$0xff]  ;;  %v39_v25 = vld [vmem:[%s1624_s2 + $0x60] sm:$0xff] }
   0x9   :  { %275 = vperm.xlu0 %1182, %v28_v10   ;;  %v1195_v24 = vld [vmem:[%s1623_s1 + $0x18] sm:$0xff]   ;;  %v40_v26 = vld [vmem:[%s1624_s2 + $0x68] sm:$0xff]  ;;  %v1196_v27 = vld [vmem:[%s1623_s1 + $0x20] sm:$0xff]  }
   0xa   :  { %v41_v28 = vld [vmem:[%s1624_s2 + $0x70] sm:$0xff]  ;;  %v42_v29 = vld [vmem:[%s1624_s2 + $0x78] sm:$0xff]  ;;  %v1197_v30 = vld [vmem:[%s1623_s1 + $0x28] sm:$0xff]  }
   0xb   :  { %1058 = vmatpush3.bf16.msra.mxu0 %v1186_v3  ;;  %v1198_v31 = vld [vmem:[%s1623_s1 + $0x30] sm:$0xff]   ;;  %v1199_v32 = vld [vmem:[%s1623_s1 + $0x38] sm:$0xff]   ;;  %v1356_v33 = vld [vmem:[%s1625_s0] sm:$0xff]  }
   0xc   :  { %1059 = vmatprep.subr.bf16.mxu0 %v1187_v4  ;;  %295 = vperm.xlu1 %1183, %v32_v14   ;;  %v1208_v34 = vld [vmem:[%s1626_s4] sm:$0xff]   ;;  %v1209_v35 = vld [vmem:[%s1626_s4 + $0x8] sm:$0xff]   ;;  %v1210_v36 = vld [vmem:[%s1626_s4 + $0x10] sm:$0xff]  }
   0xd   :  { %290 = vperm.xlu0 %1182, %v31_v13   ;;  %1101 = vmatprep.mubr.bf16.mxu1 %v1356_v33  ;;  %v1211_v37 = vld [vmem:[%s1626_s4 + $0x18] sm:$0xff]   ;;  %v1212_v38 = vld [vmem:[%s1626_s4 + $0x20] sm:$0xff]  }
   0xf   :  { %1060 = vmatpush3.bf16.msra.mxu0 %v1187_v4 }
  0x10   :  { %1061 = vmatprep.subr.bf16.mxu0 %v1188_v6  ;;  %305 = vperm.xlu1 %1183, %v34_v17  }
  0x11   :  { %300 = vperm.xlu0 %1182, %v33_v16  }
  0x13   :  { %1062 = vmatpush3.bf16.msra.mxu0 %v1188_v6 }
  0x14   :  { %1063 = vmatprep.subr.bf16.mxu0 %v1189_v7  ;;  %315 = vperm.xlu1 %1183, %v36_v20  }
  0x15   :  { %310 = vperm.xlu0 %1182, %v35_v19  }
  0x17   :  { %1064 = vmatpush3.bf16.msra.mxu0 %v1189_v7 }
  0x18   :  { %1065 = vmatprep.subr.bf16.mxu0 %v1190_v12  ;;  %325 = vperm.xlu1 %1183, %v38_v23  }
  0x19   :  { %320 = vperm.xlu0 %1182, %v37_v22  }
  0x1b   :  { %1066 = vmatpush3.bf16.msra.mxu0 %v1190_v12 }
  0x1c   :  { %1067 = vmatprep.subr.bf16.mxu0 %v1191_v15  ;;  %335 = vperm.xlu1 %1183, %v40_v26  }
  0x1d   :  { %330 = vperm.xlu0 %1182, %v39_v25  }
  0x1f   :  { %1068 = vmatpush3.bf16.msra.mxu0 %v1191_v15 }
  0x20   :  { %345 = vperm.xlu1 %1183, %v42_v29   ;;  %1117 = vmatprep.subr.bf16.mxu0 %v1208_v34 }
  0x21   :  { %340 = vperm.xlu0 %1182, %v41_v28  }
  0x22   :  { %1070 = vmatmul.mubr.bf16.vlgmr.msra.gmra.mrb[0].mxu0 %v1193_v18 }
  0x23   :  { %1073 = vmatprep.mubr.bf16.mxu0 %v1194_v21  ;;  %1118 = vmatpush3.bf16.msra.mxu0 %v1208_v34  ;;  %v1437_v34 = vld [vmem:[%s1625_s0 + $0x18] sm:$0xff]  }
  0x24   :  { %1119 = vmatprep.subr.bf16.mxu0 %v1209_v35 }
  0x27   :  { %1120 = vmatpush3.bf16.msra.mxu0 %v1209_v35  ;;  %v1442_v35 = vld [vmem:[%s1625_s0 + $0x20] sm:$0xff]  }
  0x28   :  { %1121 = vmatprep.subr.bf16.mxu0 %v1210_v36 }
  0x2a   :  { %1074 = vmatmul.mubr.bf16.gmra.mrb[4].mxu0 %v1195_v24 }
  0x2b   :  { %1077 = vmatprep.mubr.bf16.mxu0 %v1196_v27  ;;  %1122 = vmatpush3.bf16.msra.mxu0 %v1210_v36  ;;  %v1449_v36 = vld [vmem:[%s1625_s0 + $0x28] sm:$0xff]  }
  0x2c   :  { %1123 = vmatprep.subr.bf16.mxu0 %v1211_v37 }
  0x2f   :  { %1124 = vmatpush3.bf16.msra.mxu0 %v1211_v37  ;;  %v1454_v37 = vld [vmem:[%s1625_s0 + $0x30] sm:$0xff]  }
  0x30   :  { %1125 = vmatprep.subr.bf16.mxu0 %v1212_v38 }
  0x32   :  { %1078 = vmatmul.mubr.bf16.gmra.mrb[8].mxu0 %v1197_v30 }
  0x33   :  { %1081 = vmatprep.mubr.bf16.mxu0 %v1198_v31  ;;  %1126 = vmatpush3.bf16.msra.mxu0 %v1212_v38  ;;  %v1425_v31 = vld [vmem:[%s1625_s0 + $0x8] sm:$0xff]   ;;  %v1461_v38 = vld [vmem:[%s1625_s0 + $0x38] sm:$0xff]  }
  0x3a   :  { %1082 = vmatmul.mubr.bf16.gmra.mrb[12].mxu0 %v1199_v32  ;;  %v1430_v32 = vld [vmem:[%s1625_s0 + $0x10] sm:$0xff]  }
  0x83   :  { %v1376_v40 = vpop.permute.xlu1 %280 }
  0x84   :  { %v1374_v39 = vpop.permute.xlu0 %270 }
  0x87   :  { %v1380_v42 = vpop.permute.xlu1 %285 }
  0x88   :  { %v1378_v41 = vpop.permute.xlu0 %275 }
  0x8b   :  { %v1384_v44 = vpop.permute.xlu1 %295 }
  0x8c   :  { %v1382_v43 = vpop.permute.xlu0 %290 }
  0x8f   :  { %v1388_v48 = vpop.permute.xlu1 %305 }
  0x90   :  { %v1386_v46 = vpop.permute.xlu0 %300 }
  0x93   :  { %v1396_v58 = vpop.permute.xlu1 %315 }
  0x94   :  { %v1394_v57 = vpop.permute.xlu0 %310 }
  0x97   :  { %v1404_v5 = vpop.permute.xlu1 %325 }
  0x98   :  { %v1402_v3 = vpop.permute.xlu0 %320 }
  0x9b   :  { %v1410_v14 = vpop.permute.xlu1 %335 }
  0x9c   :  { %v1406_v10 = vpop.permute.xlu0 %330 }
  0x9f   :  { %v1416_v22 = vpop.permute.xlu1 %345 }
  0xa0   :  { %v1414_v20 = vpop.permute.xlu0 %340 }
  0xf5   :  { %v1071_v45 = vpop.f32.mrb[0].mxu0 }
  0xf6   :  { %v205_v47 = vpop.f32.mrb[1].mxu0  ;;  %v350_v50 = vmul.f32 %v1071_v45, %v1376_v40  ;;  %v1213_v45 = vld [vmem:[%s1626_s4 + $0x28] sm:$0xff]  }
  0xf7   :  { %v1072_v49 = vpop.f32.mrb[2].mxu0  ;;  %v348_v53 = vmul.f32 %v1374_v39, %v205_v47  ;;  %1127 = vmatprep.subr.bf16.mxu0 %v1213_v45  ;;  %v1214_v47 = vld [vmem:[%s1626_s4 + $0x30] sm:$0xff]  }
  0xf8   :  { %v351_v51 = vmul.f32 %v1072_v49, %v1380_v42  ;;  %v208_v52 = vpop.f32.mrb[3].mxu0  ;;  %1128 = vmatpush3.bf16.msra.mxu0 %v1213_v45  ;;  %v1215_v49 = vld [vmem:[%s1626_s4 + $0x38] sm:$0xff]  }
  0xf9   :  { %v349_v54 = vmul.f32 %v1378_v41, %v208_v52  ;;  %1129 = vmatprep.subr.bf16.mxu0 %v1214_v47 }
  0xfa   :  { %v381_v55 = vpack.c.bf16 %v351_v51, %v350_v50 }
  0xfb   :  { %v380_v56 = vpack.c.bf16 %v349_v54, %v348_v53  ;;  %v1483_v53 = vld [vmem:[%s1627_s5 + $0x1] ss:$0 sm:$0xff] }
  0xfc   :  { %1130 = vmatpush3.bf16.msra.mxu0 %v1214_v47 }
  0xfd   :  { %v1075_v59 = vpop.f32.mrb[4].mxu0  ;;  %1085 = vmatprep.subr.bf16.mxu1 %v380_v56  ;;  %1131 = vmatprep.subr.bf16.mxu0 %v1215_v49 }
  0xfe   :  { %v221_v60 = vpop.f32.mrb[5].mxu0  ;;  %1086 = vmatpush3.bf16.msra.mxu1 %v380_v56  ;;  %v354_v62 = vmul.f32 %v1075_v59, %v1386_v46 }
  0xff   :  { %v1076_v61 = vpop.f32.mrb[6].mxu0  ;;  %1087 = vmatprep.subr.bf16.mxu1 %v381_v55  ;;  %v352_v1 = vmul.f32 %v1382_v43, %v221_v60 }
 0x100   :  { %v355_v63 = vmul.f32 %v1076_v61, %v1388_v48  ;;  %v224_v0 = vpop.f32.mrb[7].mxu0  ;;  %1132 = vmatpush3.bf16.msra.mxu0 %v1215_v49 }
 0x101   :  { %v353_v2 = vmul.f32 %v1384_v44, %v224_v0 }
 0x102   :  { %v383_v4 = vpack.c.bf16 %v355_v63, %v354_v62  ;;  %1088 = vmatpush3.bf16.msra.mxu1 %v381_v55 }
 0x103   :  { %v382_v6 = vpack.c.bf16 %v353_v2, %v352_v1 }
 0x105   :  { %v1079_v7 = vpop.f32.mrb[8].mxu0  ;;  %1089 = vmatprep.subr.bf16.mxu1 %v382_v6 }
 0x106   :  { %v237_v8 = vpop.f32.mrb[9].mxu0  ;;  %1090 = vmatpush3.bf16.msra.mxu1 %v382_v6  ;;  %v358_v11 = vmul.f32 %v1079_v7, %v1402_v3 }
 0x107   :  { %v1080_v9 = vpop.f32.mrb[10].mxu0  ;;  %1091 = vmatprep.subr.bf16.mxu1 %v383_v4  ;;  %v356_v15 = vmul.f32 %v1394_v57, %v237_v8 }
 0x108   :  { %v359_v12 = vmul.f32 %v1080_v9, %v1404_v5  ;;  %v240_v13 = vpop.f32.mrb[11].mxu0 }
 0x109   :  { %v357_v16 = vmul.f32 %v1396_v58, %v240_v13 }
 0x10a   :  { %v385_v17 = vpack.c.bf16 %v359_v12, %v358_v11  ;;  %1092 = vmatpush3.bf16.msra.mxu1 %v383_v4 }
 0x10b   :  { %v384_v18 = vpack.c.bf16 %v357_v16, %v356_v15 }
 0x10d   :  { %v1083_v19 = vpop.f32.mrb[12].mxu0  ;;  %1093 = vmatprep.subr.bf16.mxu1 %v384_v18 }
 0x10e   :  { %v253_v21 = vpop.f32.mrb[13].mxu0  ;;  %1094 = vmatpush3.bf16.msra.mxu1 %v384_v18  ;;  %v362_v24 = vmul.f32 %v1083_v19, %v1414_v20 }
 0x10f   :  { %v1084_v23 = vpop.f32.mrb[14].mxu0  ;;  %1095 = vmatprep.subr.bf16.mxu1 %v385_v17  ;;  %v360_v27 = vmul.f32 %v1406_v10, %v253_v21 }
 0x110   :  { %v363_v25 = vmul.f32 %v1084_v23, %v1416_v22  ;;  %v256_v26 = vpop.f32.mrb[15].mxu0 }
 0x111   :  { %v361_v28 = vmul.f32 %v1410_v14, %v256_v26 }
 0x112   :  { %v387_v29 = vpack.c.bf16 %v363_v25, %v362_v24  ;;  %1096 = vmatpush3.bf16.msra.mxu1 %v385_v17 }
 0x113   :  { %v386_v30 = vpack.c.bf16 %v361_v28, %v360_v27 }
 0x115   :  { %1097 = vmatprep.subr.bf16.mxu1 %v386_v30 }
 0x116   :  { %1098 = vmatpush3.bf16.msra.mxu1 %v386_v30 }
 0x117   :  { %1099 = vmatprep.subr.bf16.mxu1 %v387_v29 }
 0x11a   :  { %1100 = vmatpush3.bf16.msra.mxu1 %v387_v29 }
 0x11d   :  { %1102 = vmatmul.mubr.bf16.vlgmr.msra.gmra.mrb[0].mxu1 %v1425_v31 }
 0x11e   :  { %1105 = vmatprep.mubr.bf16.mxu1 %v1430_v32 }
 0x125   :  { %1106 = vmatmul.mubr.bf16.gmra.mrb[4].mxu1 %v1437_v34 }
 0x126   :  { %1109 = vmatprep.mubr.bf16.mxu1 %v1442_v35 }
 0x12d   :  { %1110 = vmatmul.mubr.bf16.gmra.mrb[8].mxu1 %v1449_v36 }
 0x12e   :  { %1113 = vmatprep.mubr.bf16.mxu1 %v1454_v37 }
 0x135   :  { %1114 = vmatmul.mubr.bf16.gmra.mrb[12].mxu1 %v1461_v38 }
 0x136   :  { %1165 = vmatprep.mubr.bf16.mxu1 %v1356_v33  ;;  %v1477_v33 = vld [vmem:[%s1627_s5] ss:$0 sm:$0xff] }
 0x1f0   :  { %v1103_v50 = vpop.f32.mrb[0].mxu1 }
 0x1f1   :  { %v535_v51 = vmul.f32 %v1103_v50, %v1376_v40  ;;  %v470_v52 = vpop.f32.mrb[1].mxu1 }
 0x1f2   :  { %v533_v54 = vmul.f32 %v470_v52, %v1374_v39  ;;  %v1104_v55 = vpop.f32.mrb[2].mxu1 }
 0x1f3   :  { %v556_v56 = vmul.f32 %v1477_v33, %v535_v51  ;;  %v536_v59 = vmul.f32 %v1104_v55, %v1380_v42  ;;  %v473_v60 = vpop.f32.mrb[3].mxu1 }
 0x1f4   :  { %v554_v61 = vmul.f32 %v1477_v33, %v533_v54  ;;  %v534_v62 = vmul.f32 %v473_v60, %v1378_v41 }
 0x1f5   :  { %v577_v63 = vadd.f32 %v1483_v53, %v556_v56  ;;  %v557_v0 = vmul.f32 %v1477_v33, %v536_v59 }
 0x1f6   :  { %v575_v1 = vadd.f32 %v1483_v53, %v554_v61  ;;  %v555_v2 = vmul.f32 %v1477_v33, %v534_v62 }
 0x1f7   :  { %v578_v4 = vadd.f32 %v1483_v53, %v557_v0  ;;  %v593_v8 = vmax.f32 %v577_v63, 0.0 }
 0x1f8   :  { %v576_v6 = vadd.f32 %v1483_v53, %v555_v2  ;;  %v1107_v7 = vpop.f32.mrb[4].mxu1  ;;  %v591_v13 = vmax.f32 %v575_v1, 0.0 }
 0x1f9   :  { %v594_v9 = vmax.f32 %v578_v4, 0.0  ;;  %v539_v11 = vmul.f32 %v1107_v7, %v1386_v46  ;;  %v486_v12 = vpop.f32.mrb[5].mxu1 }
 0x1fa   :  { %v592_v15 = vmax.f32 %v576_v6, 0.0  ;;  %v537_v16 = vmul.f32 %v486_v12, %v1382_v43  ;;  %v1108_v17 = vpop.f32.mrb[6].mxu1 }
 0x1fb   :  { %v608_v18 = vpack.c.bf16 %v594_v9, %v593_v8  ;;  %v560_v19 = vmul.f32 %v1477_v33, %v539_v11  ;;  %v540_v21 = vmul.f32 %v1108_v17, %v1388_v48  ;;  %v489_v23 = vpop.f32.mrb[7].mxu1 }
 0x1fc   :  { %v558_v24 = vmul.f32 %v1477_v33, %v537_v16  ;;  %v538_v25 = vmul.f32 %v489_v23, %v1384_v44  ;;  %v607_v26 = vpack.c.bf16 %v592_v15, %v591_v13 }
 0x1fd   :  { %v581_v27 = vadd.f32 %v1483_v53, %v560_v19  ;;  %v561_v28 = vmul.f32 %v1477_v33, %v540_v21 }
 0x1fe   :  { %v579_v29 = vadd.f32 %v1483_v53, %v558_v24  ;;  %v559_v30 = vmul.f32 %v1477_v33, %v538_v25  ;;  %1133 = vmatprep.mubr.bf16.mxu0 %v607_v26 }
 0x1ff   :  { %v582_v45 = vadd.f32 %v1483_v53, %v561_v28  ;;  %1134 = vmatmul.mubr.bf16.vlgmr.msra.gmra.mrb[16].mxu0 %v608_v18  ;;  %v597_v50 = vmax.f32 %v581_v27, 0.0 }
 0x200   :  { %v580_v47 = vadd.f32 %v1483_v53, %v559_v30  ;;  %v1111_v49 = vpop.f32.mrb[8].mxu1  ;;  %v595_v55 = vmax.f32 %v579_v29, 0.0 }
 0x201   :  { %v598_v51 = vmax.f32 %v582_v45, 0.0  ;;  %v543_v52 = vmul.f32 %v1111_v49, %v1402_v3  ;;  %v502_v54 = vpop.f32.mrb[9].mxu1 }
 0x202   :  { %v596_v56 = vmax.f32 %v580_v47, 0.0  ;;  %v541_v59 = vmul.f32 %v502_v54, %v1394_v57  ;;  %v1112_v60 = vpop.f32.mrb[10].mxu1 }
 0x203   :  { %v564_v61 = vmul.f32 %v1477_v33, %v543_v52  ;;  %v544_v62 = vmul.f32 %v1112_v60, %v1404_v5  ;;  %v505_v63 = vpop.f32.mrb[11].mxu1  ;;  %v610_v0 = vpack.c.bf16 %v598_v51, %v597_v50 }
 0x204   :  { %v562_v1 = vmul.f32 %v1477_v33, %v541_v59  ;;  %v542_v2 = vmul.f32 %v505_v63, %v1396_v58  ;;  %v609_v4 = vpack.c.bf16 %v596_v56, %v595_v55 }
 0x205   :  { %v585_v6 = vadd.f32 %v1483_v53, %v564_v61  ;;  %v565_v7 = vmul.f32 %v1477_v33, %v544_v62 }
 0x206   :  { %v583_v8 = vadd.f32 %v1483_v53, %v562_v1  ;;  %v563_v9 = vmul.f32 %v1477_v33, %v542_v2  ;;  %1137 = vmatprep.mubr.bf16.mxu0 %v609_v4 }
 0x207   :  { %v586_v11 = vadd.f32 %v1483_v53, %v565_v7  ;;  %1138 = vmatmul.mubr.bf16.gmra.mrb[20].mxu0 %v610_v0  ;;  %v601_v15 = vmax.f32 %v585_v6, 0.0 }
 0x208   :  { %v584_v12 = vadd.f32 %v1483_v53, %v563_v9  ;;  %v1115_v13 = vpop.f32.mrb[12].mxu1  ;;  %v599_v19 = vmax.f32 %v583_v8, 0.0 }
 0x209   :  { %v602_v16 = vmax.f32 %v586_v11, 0.0  ;;  %v547_v17 = vmul.f32 %v1115_v13, %v1414_v20  ;;  %v518_v18 = vpop.f32.mrb[13].mxu1 }
 0x20a   :  { %v600_v21 = vmax.f32 %v584_v12, 0.0  ;;  %v545_v23 = vmul.f32 %v518_v18, %v1406_v10  ;;  %v1116_v24 = vpop.f32.mrb[14].mxu1 }
 0x20b   :  { %v568_v25 = vmul.f32 %v1477_v33, %v547_v17  ;;  %v548_v26 = vmul.f32 %v1116_v24, %v1416_v22  ;;  %v521_v27 = vpop.f32.mrb[15].mxu1  ;;  %v612_v28 = vpack.c.bf16 %v602_v16, %v601_v15 }
 0x20c   :  { %v566_v29 = vmul.f32 %v1477_v33, %v545_v23  ;;  %v546_v30 = vmul.f32 %v521_v27, %v1410_v14  ;;  %v611_v45 = vpack.c.bf16 %v600_v21, %v599_v19 }
 0x20d   :  { %v589_v47 = vadd.f32 %v1483_v53, %v568_v25  ;;  %v569_v49 = vmul.f32 %v1477_v33, %v548_v26 }
 0x20e   :  { %v587_v50 = vadd.f32 %v1483_v53, %v566_v29  ;;  %v567_v51 = vmul.f32 %v1477_v33, %v546_v30  ;;  %1141 = vmatprep.mubr.bf16.mxu0 %v611_v45 }
 0x20f   :  { %v590_v52 = vadd.f32 %v1483_v53, %v569_v49  ;;  %1142 = vmatmul.mubr.bf16.gmra.mrb[24].mxu0 %v612_v28  ;;  %v605_v55 = vmax.f32 %v589_v47, 0.0 }
 0x210   :  { %v588_v54 = vadd.f32 %v1483_v53, %v567_v51  ;;  %v603_v59 = vmax.f32 %v587_v50, 0.0 }
 0x211   :  { %v606_v56 = vmax.f32 %v590_v52, 0.0 }
 0x212   :  { %v604_v60 = vmax.f32 %v588_v54, 0.0 }
 0x213   :  { %v614_v61 = vpack.c.bf16 %v606_v56, %v605_v55 }
 0x214   :  { %v613_v62 = vpack.c.bf16 %v604_v60, %v603_v59 }
 0x216   :  { %1145 = vmatprep.mubr.bf16.mxu0 %v613_v62 }
 0x217   :  { %1146 = vmatmul.mubr.bf16.gmra.mrb[28].mxu0 %v614_v61 }
 0x2d2   :  { %v1135_v63 = vpop.f32.mrb[16].mxu0 }
 0x2d3   :  { %v713_v0 = vpop.f32.mrb[17].mxu0  ;;  %v778_v2 = vmul.f32 %v1135_v63, %v1376_v40  ;;  %v988_v63 = vld [vmem:[%s1628_s6] ss:$0 sm:$0xff] }
 0x2d4   :  { %v1136_v1 = vpop.f32.mrb[18].mxu0  ;;  %v776_v6 = vmul.f32 %v713_v0, %v1374_v39 }
 0x2d5   :  { %v779_v33 = vmul.f32 %v1136_v1, %v1380_v42  ;;  %v716_v4 = vpop.f32.mrb[19].mxu0 }
 0x2d6   :  { %v777_v53 = vmul.f32 %v716_v4, %v1378_v41 }
 0x2d7   :  { %v793_v7 = vpack.c.bf16 %v779_v33, %v778_v2 }
 0x2d8   :  { %v792_v8 = vpack.c.bf16 %v777_v53, %v776_v6 }
 0x2da   :  { %v1139_v9 = vpop.f32.mrb[20].mxu0  ;;  %1149 = vmatprep.subr.bf16.mxu1 %v792_v8 }
 0x2db   :  { %v729_v11 = vpop.f32.mrb[21].mxu0  ;;  %1150 = vmatpush3.bf16.msra.mxu1 %v792_v8  ;;  %v782_v13 = vmul.f32 %v1139_v9, %v1386_v46 }
 0x2dc   :  { %v1140_v12 = vpop.f32.mrb[22].mxu0  ;;  %1151 = vmatprep.subr.bf16.mxu1 %v793_v7  ;;  %v780_v17 = vmul.f32 %v729_v11, %v1382_v43 }
 0x2dd   :  { %v783_v15 = vmul.f32 %v1140_v12, %v1388_v48  ;;  %v732_v16 = vpop.f32.mrb[23].mxu0 }
 0x2de   :  { %v781_v18 = vmul.f32 %v732_v16, %v1384_v44 }
 0x2df   :  { %v795_v19 = vpack.c.bf16 %v783_v15, %v782_v13  ;;  %1152 = vmatpush3.bf16.msra.mxu1 %v793_v7 }
 0x2e0   :  { %v794_v21 = vpack.c.bf16 %v781_v18, %v780_v17 }
 0x2e2   :  { %v1143_v23 = vpop.f32.mrb[24].mxu0  ;;  %1153 = vmatprep.subr.bf16.mxu1 %v794_v21 }
 0x2e3   :  { %v745_v24 = vpop.f32.mrb[25].mxu0  ;;  %1154 = vmatpush3.bf16.msra.mxu1 %v794_v21  ;;  %v786_v26 = vmul.f32 %v1143_v23, %v1402_v3 }
 0x2e4   :  { %v1144_v25 = vpop.f32.mrb[26].mxu0  ;;  %1155 = vmatprep.subr.bf16.mxu1 %v795_v19  ;;  %v784_v29 = vmul.f32 %v745_v24, %v1394_v57 }
 0x2e5   :  { %v787_v27 = vmul.f32 %v1144_v25, %v1404_v5  ;;  %v748_v28 = vpop.f32.mrb[27].mxu0 }
 0x2e6   :  { %v785_v30 = vmul.f32 %v748_v28, %v1396_v58 }
 0x2e7   :  { %v797_v45 = vpack.c.bf16 %v787_v27, %v786_v26  ;;  %1156 = vmatpush3.bf16.msra.mxu1 %v795_v19 }
 0x2e8   :  { %v796_v47 = vpack.c.bf16 %v785_v30, %v784_v29 }
 0x2ea   :  { %v1147_v49 = vpop.f32.mrb[28].mxu0  ;;  %1157 = vmatprep.subr.bf16.mxu1 %v796_v47 }
 0x2eb   :  { %v761_v50 = vpop.f32.mrb[29].mxu0  ;;  %1158 = vmatpush3.bf16.msra.mxu1 %v796_v47  ;;  %v790_v52 = vmul.f32 %v1147_v49, %v1414_v20 }
 0x2ec   :  { %v1148_v51 = vpop.f32.mrb[30].mxu0  ;;  %1159 = vmatprep.subr.bf16.mxu1 %v797_v45  ;;  %v788_v56 = vmul.f32 %v761_v50, %v1406_v10 }
 0x2ed   :  { %v791_v54 = vmul.f32 %v1148_v51, %v1416_v22  ;;  %v764_v55 = vpop.f32.mrb[31].mxu0 }
 0x2ee   :  { %v789_v59 = vmul.f32 %v764_v55, %v1410_v14 }
 0x2ef   :  { %v799_v60 = vpack.c.bf16 %v791_v54, %v790_v52  ;;  %1160 = vmatpush3.bf16.msra.mxu1 %v797_v45 }
 0x2f0   :  { %v798_v61 = vpack.c.bf16 %v789_v59, %v788_v56 }
 0x2f2   :  { %1161 = vmatprep.subr.bf16.mxu1 %v798_v61 }
 0x2f3   :  { %1162 = vmatpush3.bf16.msra.mxu1 %v798_v61 }
 0x2f4   :  { %1163 = vmatprep.subr.bf16.mxu1 %v799_v60 }
 0x2f7   :  { %1164 = vmatpush3.bf16.msra.mxu1 %v799_v60 }
 0x2fa   :  { %1166 = vmatmul.mubr.bf16.vlgmr.msra.gmra.mrb[16].mxu1 %v1425_v31 }
 0x2fb   :  { %1169 = vmatprep.mubr.bf16.mxu1 %v1430_v32 }
 0x302   :  { %1170 = vmatmul.mubr.bf16.gmra.mrb[20].mxu1 %v1437_v34 }
 0x303   :  { %1173 = vmatprep.mubr.bf16.mxu1 %v1442_v35 }
 0x30a   :  { %1174 = vmatmul.mubr.bf16.gmra.mrb[24].mxu1 %v1449_v36 }
 0x30b   :  { %1177 = vmatprep.mubr.bf16.mxu1 %v1454_v37 }
 0x312   :  { %1178 = vmatmul.mubr.bf16.gmra.mrb[28].mxu1 %v1461_v38 }
 0x3cd   :  { %v1167_v62 = vpop.f32.mrb[16].mxu1 }
 0x3ce   :  { %v899_v0 = vmul.f32 %v1167_v62, %v1376_v40  ;;  %v834_v31 = vpop.f32.mrb[17].mxu1 }
 0x3cf   :  { %v897_v32 = vmul.f32 %v834_v31, %v1374_v39  ;;  %v1168_v1 = vpop.f32.mrb[18].mxu1 }
 0x3d0   :  { %v920_v34 = vadd.f32 %v988_v63, %v899_v0  ;;  %v900_v35 = vmul.f32 %v1168_v1, %v1380_v42  ;;  %v837_v2 = vpop.f32.mrb[19].mxu1 }
 0x3d1   :  { %v918_v36 = vadd.f32 %v988_v63, %v897_v32  ;;  %v898_v37 = vmul.f32 %v837_v2, %v1378_v41 }
 0x3d2   :  { %936 = vst [vmem:[%s1629_s7 + $0x10] sm:$0xff] %v920_v34  ;;  %v921_v38 = vadd.f32 %v988_v63, %v900_v35 }
 0x3d3   :  { %934 = vst [vmem:[%s1629_s7] sm:$0xff] %v918_v36  ;;  %v919_v40 = vadd.f32 %v988_v63, %v898_v37 }
 0x3d4   :  { %937 = vst [vmem:[%s1629_s7 + $0x18] sm:$0xff] %v921_v38 }
 0x3d5   :  { %935 = vst [vmem:[%s1629_s7 + $0x8] sm:$0xff] %v919_v40  ;;  %v1171_v39 = vpop.f32.mrb[20].mxu1 }
 0x3d6   :  { %v903_v41 = vmul.f32 %v1171_v39, %v1386_v46  ;;  %v850_v42 = vpop.f32.mrb[21].mxu1 }
 0x3d7   :  { %v901_v33 = vmul.f32 %v850_v42, %v1382_v43  ;;  %v1172_v4 = vpop.f32.mrb[22].mxu1 }
 0x3d8   :  { %v924_v6 = vadd.f32 %v988_v63, %v903_v41  ;;  %v904_v53 = vmul.f32 %v1172_v4, %v1388_v48  ;;  %v853_v7 = vpop.f32.mrb[23].mxu1 }
 0x3d9   :  { %v922_v8 = vadd.f32 %v988_v63, %v901_v33  ;;  %v902_v9 = vmul.f32 %v853_v7, %v1384_v44 }
 0x3da   :  { %940 = vst [vmem:[%s1629_s7 + $0x30] sm:$0xff] %v924_v6  ;;  %v925_v11 = vadd.f32 %v988_v63, %v904_v53 }
 0x3db   :  { %938 = vst [vmem:[%s1629_s7 + $0x20] sm:$0xff] %v922_v8  ;;  %v923_v46 = vadd.f32 %v988_v63, %v902_v9 }
 0x3dc   :  { %941 = vst [vmem:[%s1629_s7 + $0x38] sm:$0xff] %v925_v11 }
 0x3dd   :  { %939 = vst [vmem:[%s1629_s7 + $0x28] sm:$0xff] %v923_v46  ;;  %v1175_v43 = vpop.f32.mrb[24].mxu1 }
 0x3de   :  { %v907_v44 = vmul.f32 %v1175_v43, %v1402_v3  ;;  %v866_v48 = vpop.f32.mrb[25].mxu1 }
 0x3df   :  { %v905_v12 = vmul.f32 %v866_v48, %v1394_v57  ;;  %v1176_v13 = vpop.f32.mrb[26].mxu1 }
 0x3e0   :  { %v928_v15 = vadd.f32 %v988_v63, %v907_v44  ;;  %v908_v16 = vmul.f32 %v1176_v13, %v1404_v5  ;;  %v869_v17 = vpop.f32.mrb[27].mxu1 }
 0x3e1   :  { %v926_v18 = vadd.f32 %v988_v63, %v905_v12  ;;  %v906_v19 = vmul.f32 %v869_v17, %v1396_v58 }
 0x3e2   :  { %944 = vst [vmem:[%s1629_s7 + $0x50] sm:$0xff] %v928_v15  ;;  %v929_v21 = vadd.f32 %v988_v63, %v908_v16 }
 0x3e3   :  { %942 = vst [vmem:[%s1629_s7 + $0x40] sm:$0xff] %v926_v18  ;;  %v927_v3 = vadd.f32 %v988_v63, %v906_v19 }
 0x3e4   :  { %945 = vst [vmem:[%s1629_s7 + $0x58] sm:$0xff] %v929_v21 }
 0x3e5   :  { %943 = vst [vmem:[%s1629_s7 + $0x48] sm:$0xff] %v927_v3  ;;  %v1179_v57 = vpop.f32.mrb[28].mxu1 }
 0x3e6   :  { %v911_v58 = vmul.f32 %v1179_v57, %v1414_v20  ;;  %v882_v5 = vpop.f32.mrb[29].mxu1 }
 0x3e7   :  { %v909_v23 = vmul.f32 %v882_v5, %v1406_v10  ;;  %v1180_v24 = vpop.f32.mrb[30].mxu1 }
 0x3e8   :  { %v932_v25 = vadd.f32 %v988_v63, %v911_v58  ;;  %v912_v26 = vmul.f32 %v1180_v24, %v1416_v22  ;;  %v885_v27 = vpop.f32.mrb[31].mxu1 }
 0x3e9   :  { %v930_v28 = vadd.f32 %v988_v63, %v909_v23  ;;  %v910_v29 = vmul.f32 %v885_v27, %v1410_v14 }
 0x3ea   :  { %948 = vst [vmem:[%s1629_s7 + $0x70] sm:$0xff] %v932_v25  ;;  %v933_v30 = vadd.f32 %v988_v63, %v912_v26 }
 0x3eb   :  { %946 = vst [vmem:[%s1629_s7 + $0x60] sm:$0xff] %v930_v28  ;;  %v931_v20 = vadd.f32 %v988_v63, %v910_v29 }
 0x3ec   :  { %949 = vst [vmem:[%s1629_s7 + $0x78] sm:$0xff] %v933_v30 }
 0x3ed   :  { %947 = vst [vmem:[%s1629_s7 + $0x68] sm:$0xff] %v931_v20 }

</bundles_post_ra>
